<compile_context>
chip_gen: v7x
topology: tpu7x:2x2x1
jax: 0.10.0
libtpu: 0.0.40
codegen_flags: <defaults>
</compile_context>

<pallas_src>
import functools
import math

import jax
import jax.numpy as jnp
from jax.experimental import pallas as pl
from jax.experimental.pallas import tpu as pltpu

EPS = 1e-6


def _layernorm_kernel(gamma_ref, beta_ref, x_ref, o_ref, *, d_valid, eps):
    # x_ref: (TM, D) tile in VMEM; gamma/beta: (1,) f32 scalars in SMEM.
    x = x_ref[...].astype(jnp.float32)

    # mean = sum * (1/d): single cross-lane reduce + broadcast multiply.
    mean = jnp.sum(x, axis=-1, keepdims=True) * jnp.float32(1.0 / d_valid)
    diff = x - mean

    # torch .std() is the unbiased estimator (ddof=1).  Guard d==1 (torch
    # would produce NaN for that degenerate case).
    inv_dm1 = jnp.float32(1.0 / max(d_valid - 1, 1))
    var = jnp.sum(diff * diff, axis=-1, keepdims=True) * inv_dm1
    std = jnp.sqrt(var)

    # Exact reciprocal: HBM-bound kernel, so the divide latency is hidden
    # behind DMA and the result matches the torch reference bit-for-bit
    # (up to normal f32 rounding).  Fold gamma into the per-row (TM,1) scale.
    scale = gamma_ref[0] / (std + jnp.float32(eps))
    o_ref[...] = (diff * scale + beta_ref[0]).astype(o_ref.dtype)


def _vmem_budgets():
    """(per-buffer byte budget, scoped VMEM limit) gated on chip VMEM size."""
    try:
        vmem = pltpu.get_tpu_info().vmem_capacity_bytes
    except Exception:
        vmem = None
    if vmem is not None and vmem >= (100 << 20):
        # v5e / v6e: 128 MiB physical VMEM -> bigger tiles, higher scoped limit.
        return 8 << 20, 64 << 20
    # v7x (64 MiB physical per TC) or unknown: conservative budgets.
    return 4 << 20, 32 << 20


def _choose_tm(rows, d, dtype, per_buf_budget):
    """Row-tile size: ~budget-sized buffers, sublane-packed, several grid steps."""
    itemsize = jnp.dtype(dtype).itemsize
    sub = max(8, 32 // max(1, itemsize))          # 8 f32, 16 bf16, 32 int8/fp8
    row_bytes = max(1, d * itemsize)

    cap = (per_buf_budget // row_bytes) // sub * sub
    cap = max(sub, cap)
    rows_up = ((rows + sub - 1) // sub) * sub
    tm = min(cap, rows_up)

    # Prefer several grid steps (double-buffer overlap + megacore sharding on
    # v7x) while keeping each buffer >= ~1 MiB so the ~0.35 us per-step
    # overhead stays amortized.
    target_steps = 8
    min_tm = max(sub, min(tm, ((1 << 20) // row_bytes) // sub * sub))
    while tm > min_tm and (rows + tm - 1) // tm < target_steps:
        nxt = max(min_tm, ((tm // 2 + sub - 1) // sub) * sub)
        if nxt >= tm:
            break
        tm = nxt
    return max(sub, tm)


def pallas_layernorm(x: jax.Array, gamma: jax.Array, beta: jax.Array,
                     eps: float = EPS) -> jax.Array:
    """Scalar-affine layernorm over the last axis, matching the torch module."""
    orig_shape = x.shape
    d = orig_shape[-1]
    rows = math.prod(orig_shape[:-1]) if len(orig_shape) > 1 else 1
    x2 = x.reshape(rows, d)

    per_buf_budget, vmem_limit = _vmem_budgets()
    tm = _choose_tm(rows, d, x.dtype, per_buf_budget)
    grid = (pl.cdiv(rows, tm),)   # ragged last block handled by Pallas

    gamma = jnp.asarray(gamma, jnp.float32).reshape(1)
    beta = jnp.asarray(beta, jnp.float32).reshape(1)

    kernel = functools.partial(_layernorm_kernel, d_valid=d, eps=eps)

    itemsize = jnp.dtype(x.dtype).itemsize
    cost = pl.CostEstimate(
        flops=8 * rows * d,
        transcendentals=rows,
        bytes_accessed=2 * rows * d * itemsize,
    )

    out = pl.pallas_call(
        kernel,
        out_shape=jax.ShapeDtypeStruct((rows, d), x.dtype),
        grid=grid,
        in_specs=[
            pl.BlockSpec(memory_space=pltpu.MemorySpace.SMEM),  # gamma (1,)
            pl.BlockSpec(memory_space=pltpu.MemorySpace.SMEM),  # beta  (1,)
            pl.BlockSpec((tm, d), lambda i: (i, 0)),            # full last dim
        ],
        out_specs=pl.BlockSpec((tm, d), lambda i: (i, 0)),
        compiler_params=pltpu.CompilerParams(
            dimension_semantics=("parallel",),
            vmem_limit_bytes=vmem_limit,
        ),
        cost_estimate=cost,
    )(gamma, beta, x2)

    return out.reshape(orig_shape)


class DecoderPallas:
    """JAX/Pallas equivalent of the PyTorch Decoder module."""

    def __init__(self, layers=()):
        # `layers` would be a sequence of callables
        #   layer(x, encoder_output, src_mask, tgt_mask) -> x
        # The reference source does not define them, so default is empty.
        self.layers = tuple(layers)
        # LayerNormalization parameters (deterministic init, converted once).
        self.gamma = jnp.ones((1,), dtype=jnp.float32)
        self.beta = jnp.zeros((1,), dtype=jnp.float32)
        self.eps = EPS

    def __call__(self, x, encoder_output, src_mask, tgt_mask):
        for layer in self.layers:
            x = layer(x, encoder_output, src_mask, tgt_mask)
        return pallas_layernorm(x, self.gamma, self.beta, self.eps)


def _reference_layernorm(x, gamma, beta, eps=EPS):
    # Pure-JAX reference of the torch LayerNormalization forward (ddof=1).
    mean = jnp.mean(x, axis=-1, keepdims=True)
    std = jnp.std(x, axis=-1, keepdims=True, ddof=1)
    return gamma * (x - mean) / (std + eps) + beta


if __name__ == "__main__":
    key = jax.random.PRNGKey(0)
    kx, ke = jax.random.split(key)

    batch, tgt_seq, src_seq, d_model = 2, 8, 8, 32
    x = jax.random.normal(kx, (batch, tgt_seq, d_model), dtype=jnp.float32)
    encoder_output = jax.random.normal(ke, (batch, src_seq, d_model), dtype=jnp.float32)
    src_mask = jnp.ones((batch, 1, tgt_seq, src_seq), dtype=jnp.float32)
    tgt_mask = jnp.tril(jnp.ones((tgt_seq, tgt_seq), dtype=jnp.float32))[None, None]

    decoder = DecoderPallas(layers=())  # opaque layers not defined in source
    out = decoder(x, encoder_output, src_mask, tgt_mask)
    out = jax.block_until_ready(out)

    ref = _reference_layernorm(x, decoder.gamma, decoder.beta)
    assert out.shape == x.shape
    assert bool(jnp.isfinite(out).all()), "non-finite output"
    assert jnp.allclose(out, ref, atol=1e-4, rtol=1e-4), "mismatch vs reference"

    print("KERNEL_OK")
</pallas_src>

<mosaic_0001>
module attributes {stable_mosaic.version = 11 : i64} {
  func.func @_layernorm_kernel(%arg0: i32, %arg1: memref<1xf32, #tpu.memory_space<smem>>, %arg2: memref<1xf32, #tpu.memory_space<smem>>, %arg3: memref<16x32xf32, #tpu.memory_space<vmem>>, %arg4: memref<16x32xf32, #tpu.memory_space<vmem>>) attributes {dimension_semantics = [#tpu.dimension_semantics<parallel>], iteration_bounds = array<i64: 1>, scalar_prefetch = 0 : i64, scratch_operands = 0 : i64, tpu.core_type = #tpu.core_type<tc>, window_params = [{transform_indices = @transform_0, window_bounds = array<i64: 1>}, {transform_indices = @transform_1, window_bounds = array<i64: 1>}, {transform_indices = @transform_2, window_bounds = array<i64: 16, 32>}, {transform_indices = @transform_3, window_bounds = array<i64: 16, 32>}]} {
    %c0 = arith.constant 0 : index
    %c0_0 = arith.constant 0 : index
    %0 = vector.load %arg3[%c0, %c0_0] : memref<16x32xf32, #tpu.memory_space<vmem>>, vector<16x32xf32>
    %cst = arith.constant dense<0.000000e+00> : vector<16xf32>
    %1 = vector.multi_reduction <add>, %0, %cst [1] : vector<16x32xf32> to vector<16xf32>
    %2 = vector.shape_cast %1 : vector<16xf32> to vector<16x1xf32>
    %cst_1 = arith.constant 3.125000e-02 : f32
    %3 = vector.broadcast %cst_1 : f32 to vector<16x1xf32>
    %4 = arith.mulf %2, %3 : vector<16x1xf32>
    %5 = vector.broadcast %4 : vector<16x1xf32> to vector<16x32xf32>
    %6 = arith.subf %0, %5 : vector<16x32xf32>
    %7 = arith.mulf %6, %6 : vector<16x32xf32>
    %cst_2 = arith.constant dense<0.000000e+00> : vector<16xf32>
    %8 = vector.multi_reduction <add>, %7, %cst_2 [1] : vector<16x32xf32> to vector<16xf32>
    %9 = vector.shape_cast %8 : vector<16xf32> to vector<16x1xf32>
    %cst_3 = arith.constant 0.0322580636 : f32
    %10 = vector.broadcast %cst_3 : f32 to vector<16x1xf32>
    %11 = arith.mulf %9, %10 : vector<16x1xf32>
    %12 = math.sqrt %11 : vector<16x1xf32>
    %c0_4 = arith.constant 0 : index
    %13 = memref.load %arg1[%c0_4] : memref<1xf32, #tpu.memory_space<smem>>
    %cst_5 = arith.constant 9.99999997E-7 : f32
    %14 = vector.broadcast %cst_5 : f32 to vector<16x1xf32>
    %15 = arith.addf %12, %14 : vector<16x1xf32>
    %16 = vector.broadcast %13 : f32 to vector<16x1xf32>
    %17 = arith.divf %16, %15 : vector<16x1xf32>
    %18 = vector.broadcast %17 : vector<16x1xf32> to vector<16x32xf32>
    %19 = arith.mulf %6, %18 : vector<16x32xf32>
    %c0_6 = arith.constant 0 : index
    %20 = memref.load %arg2[%c0_6] : memref<1xf32, #tpu.memory_space<smem>>
    %21 = vector.broadcast %20 : f32 to vector<16x32xf32>
    %22 = arith.addf %19, %21 : vector<16x32xf32>
    %c0_7 = arith.constant 0 : index
    %c0_8 = arith.constant 0 : index
    %23 = vector.load %arg4[%c0_7, %c0_8] : memref<16x32xf32, #tpu.memory_space<vmem>>, vector<16x32xf32>
    tpu.vector_store %arg4[%c0_7, %c0_8], %22 {strides = array<i32>} : memref<16x32xf32, #tpu.memory_space<vmem>>, vector<16x32xf32>,
    return
  }
  func.func @transform_0(%arg0: i32) -> i32 {
    %c0_i32 = arith.constant 0 : i32
    %c0_i32_0 = arith.constant 0 : i32
    return %c0_i32 : i32
  }
  func.func @transform_1(%arg0: i32) -> i32 {
    %c0_i32 = arith.constant 0 : i32
    %c0_i32_0 = arith.constant 0 : i32
    return %c0_i32 : i32
  }
  func.func @transform_2(%arg0: i32) -> (i32, i32) {
    %c0_i32 = arith.constant 0 : i32
    %c0_i32_0 = arith.constant 0 : i32
    return %arg0, %c0_i32 : i32, i32
  }
  func.func @transform_3(%arg0: i32) -> (i32, i32) {
    %c0_i32 = arith.constant 0 : i32
    %c0_i32_0 = arith.constant 0 : i32
    return %arg0, %c0_i32 : i32, i32
  }
}

</mosaic_0001>

<bundles_post_ra>
// kernel: tpu_custom_call.1
= control target key start
LH: loop header
LB: loop body
LE: loop exit
PB: predicated region body
PF: predicated region fallthrough
CT: control target
= control target key end

     0   :  { %10 = vsyncpa [#allocation5], 0  ;;  %s227_s0 = inlined_call_operand.<no memory space> [shape: f32[1], index: 0, kind: input, shape index: {}]   ;;  %s228_s1 = inlined_call_operand.<no memory space> [shape: f32[1], index: 1, kind: input, shape index: {}]   ;;  %s229_s2 = inlined_call_operand.hbm [shape: f32[16,32], index: 2, kind: input, shape index: {}]   ;;  %s230_s3 = inlined_call_operand.hbm [shape: f32[16,32], index: 3, kind: output, shape index: {}]  }
   0x1   :  { %11 = vsyncpa [#allocation6], 0  ;;  %s161_s12 = smov [#allocation4]   ;;  %s113_s16 = scalar_lea.hbm %s229_s2, 256 }
   0x2   :  { %s21_s13 = sshll.u32 %s161_s12, 4  ;;  %p114_p0 = scmp.ne.s32.totalorder %s229_s2, %s113_s16  ;;  %s22_s13 = int_to_ptr.vmem [resolvable:$true] %s21_s13 }
   0x3   :  { %p117_p1 = scmp.lt.u32.totalorder %s113_s16, %s229_s2 }
   0x5   :  { %p119_p2 = pnand %p117_p1, %p114_p0 }
   0x7   :  { %122 = shalt.err (!%p119_p2)
}
   0x8   :  { %s123_s21 = scalar_lea.vmem %s22_s13, 256  ;;  %p128_p4 = scmp.lt.s32.totalorder %s22_s13, %s22_s13 }
   0x9   :  { %p124_p3 = scmp.ne.s32.totalorder %s22_s13, %s123_s21  ;;  %p129_p5 = scmp.lt.s32.totalorder %s123_s21, %s123_s21 }
   0xb   :  { %p130_p6 = por %p129_p5, %p128_p4 }
   0xd   :  { %p131_p7 = pnand %p130_p6, %p124_p3 }
   0xf   :  { %134 = shalt.err (!%p131_p7)
}
  0x10   :  { %s162_s22 = smov 128   ;;  %s163_s23 = smov 8  }
  0x11   :  { %27 = dma.hbm_to_vmem [thread:$0]  %s229_s2, 256, %s22_s13, [#allocation5], %s162_s22, %s162_s22, %s163_s23  }
  0x12   :  { %157 = dma.done.wait [#allocation5], 256  }
  0x13   :  { %158 = vsyncadd [#allocation5], 4294967040  ;;  %vm33_vm0 = vcmask 261120   ;;  %v31_v0 = vld [vmem:[#allocation4] sm:$0xff]  ;;  %v32_v1 = vld [vmem:[#allocation4 + $0x8] sm:$0xff]  ;;  %v71_v30 = vstv %s227_s0  ;;  %v79_v33 = vstv %s228_s1  ;;  %s164_s29 = smov [#allocation7]  }
  0x14   :  { %v34_v2 = vsel %vm33_vm0, %v31_v0, 0.0  ;;  %v37_v3 = vsel %vm33_vm0, %v32_v1, 0.0  ;;  %s89_s30 = sshll.u32 %s164_s29, 4  ;;  %s90_s30 = int_to_ptr.vmem [resolvable:$true] %s89_s30 }
  0x15   :  { %35 = vadd.xlane.f32.xlu0 %v34_v2  ;;  %s135_s0 = scalar_lea.vmem %s90_s30, 256  ;;  %p140_p9 = scmp.lt.s32.totalorder %s90_s30, %s90_s30 }
  0x16   :  { %p136_p8 = scmp.ne.s32.totalorder %s90_s30, %s135_s0  ;;  %p141_p10 = scmp.lt.s32.totalorder %s135_s0, %s135_s0 }
  0x18   :  { %p142_p11 = por %p141_p10, %p140_p9 }
  0x19   :  { %38 = vadd.xlane.f32.xlu0 %v37_v3 }
  0x1a   :  { %p143_p12 = pnand %p142_p11, %p136_p8 }
  0xa2   :  { %v36_v4 = vpop.xlane.xlu0 %35 }
  0xa3   :  { %v40_v5 = vmul.f32 0.03125, %v36_v4 }
  0xa5   :  { %v42_v6 = vsub.f32 %v31_v0, %v40_v5 }
  0xa6   :  { %v39_v7 = vpop.xlane.xlu0 %38 }
  0xa7   :  { %v41_v8 = vmul.f32 0.03125, %v39_v7  ;;  %v44_v9 = vmul.f32 %v42_v6, %v42_v6 }
  0xa9   :  { %v43_v10 = vsub.f32 %v32_v1, %v41_v8  ;;  %v46_v11 = vsel %vm33_vm0, %v44_v9, 0.0 }
  0xaa   :  { %47 = vadd.xlane.f32.xlu1 %v46_v11 }
  0xab   :  { %v45_v12 = vmul.f32 %v43_v10, %v43_v10 }
  0xad   :  { %v49_v13 = vsel %vm33_vm0, %v45_v12, 0.0 }
  0xae   :  { %50 = vadd.xlane.f32.xlu1 %v49_v13 }
 0x137   :  { %v48_v14 = vpop.xlane.xlu1 %47 }
 0x138   :  { %v52_v15 = vmul.f32 0.032258064, %v48_v14 }
 0x13a   :  { %105 = vrsqrt.f32 %v52_v15  ;;  %vm56_vm1 = vcmp.eq.f32.partialorder %v52_v15, inf  ;;  %v59_v20 = vand.u32 2147483648, %v52_v15  ;;  %vm58_vm2 = vcmp.eq.f32.partialorder %v52_v15, 0.0 }
 0x13b   :  { %v51_v16 = vpop.xlane.xlu1 %50 }
 0x13c   :  { %v53_v17 = vmul.f32 0.032258064, %v51_v16 }
 0x13e   :  { %107 = vrsqrt.f32 %v53_v17  ;;  %vm63_vm3 = vcmp.eq.f32.partialorder %v53_v17, inf  ;;  %v66_v26 = vand.u32 2147483648, %v53_v17  ;;  %vm65_vm4 = vcmp.eq.f32.partialorder %v53_v17, 0.0 }
 0x144   :  { %v106_v18 = vpop.eup %105 }
 0x145   :  { %v55_v19 = vmul.f32 %v106_v18, %v52_v15 }
 0x147   :  { %v57_v21 = vsel %vm56_vm1, %v52_v15, %v55_v19 }
 0x148   :  { %v108_v22 = vpop.eup %107  ;;  %v60_v23 = vsel %vm58_vm2, %v59_v20, %v57_v21 }
 0x149   :  { %v69_v24 = vadd.f32 1e-06, %v60_v23  ;;  %v62_v25 = vmul.f32 %v108_v22, %v53_v17 }
 0x14b   :  { %109 = vrcp.f32 %v69_v24  ;;  %v64_v27 = vsel %vm63_vm3, %v53_v17, %v62_v25 }
 0x14c   :  { %v67_v28 = vsel %vm65_vm4, %v66_v26, %v64_v27 }
 0x14d   :  { %v70_v29 = vadd.f32 1e-06, %v67_v28 }
 0x14f   :  { %111 = vrcp.f32 %v70_v29 }
 0x155   :  { %v110_v31 = vpop.eup %109 }
 0x156   :  { %v73_v32 = vmul.f32 %v110_v31, %v71_v30 }
 0x158   :  { %v76_v34 = vmul.f32 %v73_v32, %v42_v6 }
 0x159   :  { %v112_v35 = vpop.eup %111 }
 0x15a   :  { %v75_v36 = vmul.f32 %v112_v35, %v71_v30  ;;  %v80_v37 = vadd.f32 %v79_v33, %v76_v34 }
 0x15c   :  { %v77_v38 = vmul.f32 %v75_v36, %v43_v10  ;;  %82 = vst.msk [vmem:[#allocation7] sm:$0xff] %vm33_vm0, %v80_v37 }
 0x15e   :  { %v81_v39 = vadd.f32 %v79_v33, %v77_v38 }
 0x160   :  { %83 = vst.msk [vmem:[#allocation7 + $0x8] sm:$0xff] %vm33_vm0, %v81_v39 }
 0x161   :  { %146 = shalt.err (!%p143_p12)
}
 0x162   :  { %s147_s5 = scalar_lea.hbm %s230_s3, 256 }
 0x163   :  { %p148_p13 = scmp.ne.s32.totalorder %s230_s3, %s147_s5  ;;  %p151_p0 = scmp.lt.u32.totalorder %s147_s5, %s230_s3 }
 0x165   :  { %p153_p1 = pnand %p151_p0, %p148_p13 }
 0x167   :  { %156 = shalt.err (!%p153_p1)
}
 0x168   :  { %95 = dma.vmem_to_hbm [thread:$0]  %s90_s30, 256, %s230_s3, [#allocation6], %s162_s22, %s162_s22, %s163_s23  }
 0x169   :  { %159 = dma.done.wait [#allocation6], 256  }
 0x16a   :  { %160 = vsyncadd [#allocation6], 4294967040 }
 0x16b   :  { %99 = vsyncpa [#allocation5], 1 }
 0x16c   :  { %100 = vsyncpa [#allocation6], 1 }

</bundles_post_ra>
